<compile_context>
chip_gen: v5e
topology: v5e:2x2
jax: 0.10.0
libtpu: 0.0.40
codegen_flags: <defaults>
</compile_context>

<pallas_src>
import jax
import jax.numpy as jnp
from jax.experimental import pallas as pl
from jax.experimental.pallas import tpu as pltpu

EPS = 1e-5


# --------------------------------------------------------------------------- #
# pass 1: per-batch input moments (pure X stream; no weights, no Y intermediate)
# --------------------------------------------------------------------------- #
def _stats_kernel(x_ref, s_ref, g_ref):
    # x_ref: (1, Cin, T); s_ref: (1, Cin, 1); g_ref: (1, Cin, Cin)
    # s/g are resident accumulators across the tile axis (program_id(1)).
    @pl.when(pl.program_id(1) == 0)
    def _():
        s_ref[...] = jnp.zeros_like(s_ref)
        g_ref[...] = jnp.zeros_like(g_ref)

    x = x_ref[0]                                                  # (Cin, T)
    s_ref[0] += jnp.sum(x.astype(jnp.float32), axis=1, keepdims=True)
    # Gram matrix G += X @ X^T: contract the lane axis of both operands
    # (same dot_general form as flash attention's 'bqd,bkd->bqk').
    g_ref[0] += jax.lax.dot_general(
        x, x, (((1,), (1,)), ((), ())), preferred_element_type=jnp.float32)


# --------------------------------------------------------------------------- #
# pass 2: recompute the cheap K=Cin contraction, fused normalize + ReLU
# --------------------------------------------------------------------------- #
def _make_norm_kernel(cin, use_vpu_fma):
    def _norm_kernel(x_ref, w_ref, scale_ref, shift_ref, o_ref):
        x = x_ref[0]                                              # (Cin, T)
        if use_vpu_fma:
            # Tiny Cin / 4*Cout: an MXU dot pads K to the systolic depth at <5%
            # utilization; Cin broadcast-FMAs on idle VALU slots are cheaper.
            # Keep f32 math (v5e VPU has no bf16).
            w = w_ref[...].astype(jnp.float32)                    # (4Cout, Cin)
            xf = x.astype(jnp.float32)
            y = w[:, 0:1] * xf[0:1, :]
            for k in range(1, cin):
                y = y + w[:, k:k + 1] * xf[k:k + 1, :]
        else:
            y = jnp.dot(w_ref[...], x, preferred_element_type=jnp.float32)
        o_ref[0] = jnp.maximum(y * scale_ref[...] + shift_ref[...],
                               0.0).astype(o_ref.dtype)
    return _norm_kernel


# --------------------------------------------------------------------------- #
# tiling / VMEM helpers
# --------------------------------------------------------------------------- #
def _vmem_budget_bytes():
    """vmem_limit_bytes ≈ half of physical VMEM for this chip
    (v5e/v6e 128 MiB -> 64 MiB, v7x 64 MiB -> 32 MiB)."""
    cap = 64 << 20
    try:
        info = pltpu.get_tpu_info()
        cap = int(getattr(info, "vmem_capacity_bytes", cap) or cap)
    except Exception:
        pass
    return int(min(cap // 2, 96 << 20))


def _pick_tile(hw, col_bytes, block_budget_bytes, target_block_bytes=4 << 20):
    """Largest T dividing hw, preferring multiples of 128 (lane-dense stores),
    sized so double-buffered blocks stay within block_budget_bytes and the
    per-step block is ~target_block_bytes (per-step overhead ~0.35us)."""
    cap = min(8192,
              target_block_bytes // max(col_bytes, 1),
              block_budget_bytes // max(2 * col_bytes, 1))
    cap = max(128, int(cap))
    divs = set()
    d = 1
    while d * d <= hw:
        if hw % d == 0:
            divs.add(d)
            divs.add(hw // d)
        d += 1
    best_aligned = best_any = None
    for t in sorted(divs):
        if t > cap:
            break
        best_any = t
        if t % 128 == 0:
            best_aligned = t
    if best_aligned is not None:
        return best_aligned
    if hw <= cap:
        return hw                       # full-extent block (legal at any width)
    return best_any                     # guarded fallback: never exceeds budget


# --------------------------------------------------------------------------- #
# wrapper
# --------------------------------------------------------------------------- #
def deconv2d_bn_forward(x_nchw, weight, bias=None, compute_dtype=jnp.float32):
    """x_nchw: (N, Cin, H, W); weight: (Cin, Cout, 2, 2); bias: (Cout,).
    Returns NCHW (N, Cout, 2H, 2W) = ReLU(BatchNorm2d(ConvTranspose2d_k2s2(x)))
    with BatchNorm in training mode (batch stats, gamma=1, beta=0)."""
    del bias  # per-channel constant is exactly cancelled by BN mean subtraction

    n, cin, h, w = x_nchw.shape
    cout = weight.shape[1]
    hw = h * w
    c4 = 4 * cout

    vmem_limit = _vmem_budget_bytes()
    block_budget = vmem_limit // 2      # leave headroom for spill / scratch
    in_bytes = jnp.dtype(compute_dtype).itemsize

    # Free reshape NCHW -> (N, Cin, H*W): no input-side XLA transpose.
    x3d = x_nchw.reshape(n, cin, hw).astype(compute_dtype)
    # (Cin, Cout, kh, kw) -> W^T rows ordered (kh, kw, co): (4*Cout, Cin)
    w_t = jnp.transpose(weight, (2, 3, 1, 0)).reshape(c4, cin).astype(compute_dtype)

    # ---------------- pass 1: per-batch input moments (s, G) -----------------
    t1 = _pick_tile(hw, cin * in_bytes, block_budget)
    sums, grams = pl.pallas_call(
        _stats_kernel,
        out_shape=(jax.ShapeDtypeStruct((n, cin, 1), jnp.float32),
                   jax.ShapeDtypeStruct((n, cin, cin), jnp.float32)),
        grid=(n, hw // t1),
        in_specs=[pl.BlockSpec((1, cin, t1), lambda i, j: (i, 0, j))],
        out_specs=(pl.BlockSpec((1, cin, 1), lambda i, j: (i, 0, 0)),
                   pl.BlockSpec((1, cin, cin), lambda i, j: (i, 0, 0))),
        compiler_params=pltpu.CompilerParams(
            # batch axis "parallel" -> per-core partial accumulators let v7x
            # use both TensorCores; tile (reduction) axis is "arbitrary".
            dimension_semantics=("parallel", "arbitrary"),
            vmem_limit_bytes=vmem_limit),
    )(x3d)

    # ---- tiny off-kernel folding: (s, G) -> per-channel BN scale / shift -----
    s = jnp.sum(sums, axis=0)[:, 0]                      # (Cin,)
    g = jnp.sum(grams, axis=0)                           # (Cin, Cin)
    w_f = w_t.astype(jnp.float32)                        # matches pass-2 weights
    cnt = jnp.float32(4 * n * hw)                        # elems per out-channel
    sum_taps = w_f @ s                                   # (4Cout,) Σ_hw (w_r·x)
    sq_taps = jnp.einsum('rc,cd,rd->r', w_f, g, w_f)     # (4Cout,) Σ_hw (w_r·x)²
    sum_c = jnp.sum(sum_taps.reshape(4, cout), axis=0)
    sq_c = jnp.sum(sq_taps.reshape(4, cout), axis=0)
    mean_c = sum_c / cnt
    # E[y^2]-E[y]^2 clamped at 0.  TODO(synk): switch to shifted moments if
    # |mean| >> std at production scale (catastrophic-cancellation guard).
    var_c = jnp.maximum(sq_c / cnt - mean_c * mean_c, 0.0)
    inv_c = jax.lax.rsqrt(var_c + EPS)
    scale = jnp.tile(inv_c, 4).reshape(c4, 1)            # gamma = 1
    shift = jnp.tile(-mean_c * inv_c, 4).reshape(c4, 1)  # beta  = 0

    # ---------------- pass 2: matmul recompute + normalize + ReLU ------------
    t2 = _pick_tile(hw, cin * in_bytes + c4 * 4, block_budget)
    use_vpu_fma = (cin <= 16) and (c4 <= 128)
    y_t = pl.pallas_call(
        _make_norm_kernel(cin, use_vpu_fma),
        out_shape=jax.ShapeDtypeStruct((n, c4, hw), jnp.float32),
        grid=(n, hw // t2),
        in_specs=[pl.BlockSpec((1, cin, t2), lambda i, j: (i, 0, j)),
                  pl.BlockSpec((c4, cin), lambda i, j: (0, 0)),
                  pl.BlockSpec((c4, 1), lambda i, j: (0, 0)),
                  pl.BlockSpec((c4, 1), lambda i, j: (0, 0))],
        out_specs=pl.BlockSpec((1, c4, t2), lambda i, j: (i, 0, j)),
        compiler_params=pltpu.CompilerParams(
            dimension_semantics=("parallel", "parallel"),
            vmem_limit_bytes=vmem_limit),
    )(x3d, w_t, scale, shift)

    # Epilogue: interleave the 2x2 taps into spatial positions and go to NCHW
    # in one fused XLA transpose.
    # TODO(synk): fold this interleave into pass 2's output block so the kernel
    # writes (1, Cout, 2r, 2W) NCHW tiles directly.  It requires an in-kernel
    # lane<->sublane rearrange of (4*Cout, r*W) -> (Cout, 2r, 2W); for W < 128
    # every step hits Mosaic's generic relayout path (reshape/transpose across
    # the 128-lane axis), which is not reliably supported, so the interleave is
    # left to a single fused XLA transpose instead.
    y = y_t.reshape(n, 2, 2, cout, h, w)
    y = jnp.transpose(y, (0, 3, 4, 1, 5, 2)).reshape(n, cout, 2 * h, 2 * w)
    return y


def reference_forward(x_nchw, weight, bias):
    """Pure-JAX reference of the PyTorch forward (training-mode BN, f32)."""
    n, cin, h, w = x_nchw.shape
    cout = weight.shape[1]
    y = jnp.einsum('ncij,cokl->noijkl', x_nchw, weight)
    y = y + bias[None, :, None, None, None, None]
    y = jnp.transpose(y, (0, 1, 2, 4, 3, 5)).reshape(n, cout, 2 * h, 2 * w)
    mean = y.mean(axis=(0, 2, 3), keepdims=True)
    var = y.var(axis=(0, 2, 3), keepdims=True)  # biased, like BN training mode
    return jnp.maximum((y - mean) / jnp.sqrt(var + EPS), 0.0)


if __name__ == "__main__":
    N, CIN, COUT, H, W = 2, 4, 8, 16, 16
    key = jax.random.PRNGKey(0)
    kx, kw, kb = jax.random.split(key, 3)

    x = jax.random.normal(kx, (N, CIN, H, W), dtype=jnp.float32)
    # deterministic synthetic params (shapes follow nn.ConvTranspose2d(CIN, COUT, 2, 2))
    fan_in = COUT * 2 * 2
    bound = 1.0 / float(fan_in) ** 0.5
    weight = jax.random.uniform(kw, (CIN, COUT, 2, 2), jnp.float32, -bound, bound)
    bias = jax.random.uniform(kb, (COUT,), jnp.float32, -bound, bound)

    ref = jax.block_until_ready(reference_forward(x, weight, bias))

    # f32 path: preserves the PyTorch module's numerics.
    out = jax.block_until_ready(deconv2d_bn_forward(x, weight, bias))
    assert out.shape == (N, COUT, 2 * H, 2 * W), out.shape
    err = float(jnp.max(jnp.abs(out - ref)))
    assert jnp.allclose(out, ref, rtol=5e-4, atol=5e-4), err

    # bf16-stream path: halves HBM input traffic (f32 accumulation kept).
    out_bf16 = jax.block_until_ready(
        deconv2d_bn_forward(x, weight, bias, compute_dtype=jnp.bfloat16))
    err_bf16 = float(jnp.max(jnp.abs(out_bf16 - ref)))
    assert jnp.allclose(out_bf16, ref, rtol=5e-2, atol=5e-2), err_bf16

    print("KERNEL_OK")
</pallas_src>

<mosaic_0001>
module attributes {stable_mosaic.version = 11 : i64} {
  func.func @_stats_kernel(%arg0: i32, %arg1: i32, %arg2: memref<1x4x256xf32, #tpu.memory_space<vmem>>, %arg3: memref<1x4x1xf32, #tpu.memory_space<vmem>>, %arg4: memref<1x4x4xf32, #tpu.memory_space<vmem>>) attributes {dimension_semantics = [#tpu.dimension_semantics<parallel>, #tpu.dimension_semantics<arbitrary>], iteration_bounds = array<i64: 2, 1>, scalar_prefetch = 0 : i64, scratch_operands = 0 : i64, tpu.core_type = #tpu.core_type<tc>, window_params = [{transform_indices = @transform_0, window_bounds = array<i64: 1, 4, 256>}, {transform_indices = @transform_1, window_bounds = array<i64: 1, 4, 1>}, {transform_indices = @transform_2, window_bounds = array<i64: 1, 4, 4>}]} {
    %c0_i32 = arith.constant 0 : i32
    %0 = arith.cmpi eq, %arg1, %c0_i32 : i32
    %1 = arith.extui %0 : i1 to i32
    %c0_i32_0 = arith.constant 0 : i32
    %2 = arith.cmpi ne, %1, %c0_i32_0 : i32
    scf.if %2 {
      %cst_16 = arith.constant 0.000000e+00 : f32
      %20 = vector.broadcast %cst_16 : f32 to vector<1x4x1xf32>
      %c0_17 = arith.constant 0 : index
      %c0_18 = arith.constant 0 : index
      %c0_19 = arith.constant 0 : index
      %21 = vector.load %arg3[%c0_17, %c0_18, %c0_19] : memref<1x4x1xf32, #tpu.memory_space<vmem>>, vector<1x4x1xf32>
      tpu.vector_store %arg3[%c0_17, %c0_18, %c0_19], %20 {strides = array<i32>} : memref<1x4x1xf32, #tpu.memory_space<vmem>>, vector<1x4x1xf32>,
      %cst_20 = arith.constant 0.000000e+00 : f32
      %22 = vector.broadcast %cst_20 : f32 to vector<1x4x4xf32>
      %c0_21 = arith.constant 0 : index
      %c0_22 = arith.constant 0 : index
      %c0_23 = arith.constant 0 : index
      %23 = vector.load %arg4[%c0_21, %c0_22, %c0_23] : memref<1x4x4xf32, #tpu.memory_space<vmem>>, vector<1x4x4xf32>
      tpu.vector_store %arg4[%c0_21, %c0_22, %c0_23], %22 {strides = array<i32>} : memref<1x4x4xf32, #tpu.memory_space<vmem>>, vector<1x4x4xf32>,
    } else {
    }
    %c0 = arith.constant 0 : index
    %c0_1 = arith.constant 0 : index
    %c0_2 = arith.constant 0 : index
    %3 = vector.load %arg2[%c0, %c0_1, %c0_2] : memref<1x4x256xf32, #tpu.memory_space<vmem>>, vector<1x4x256xf32>
    %4 = vector.shape_cast %3 : vector<1x4x256xf32> to vector<4x256xf32>
    %c0_3 = arith.constant 0 : index
    %c0_4 = arith.constant 0 : index
    %c0_5 = arith.constant 0 : index
    %5 = vector.load %arg3[%c0_3, %c0_4, %c0_5] : memref<1x4x1xf32, #tpu.memory_space<vmem>>, vector<1x4x1xf32>
    %6 = vector.shape_cast %5 : vector<1x4x1xf32> to vector<4x1xf32>
    %cst = arith.constant dense<0.000000e+00> : vector<4xf32>
    %7 = vector.multi_reduction <add>, %4, %cst [1] : vector<4x256xf32> to vector<4xf32>
    %8 = vector.shape_cast %7 : vector<4xf32> to vector<4x1xf32>
    %9 = arith.addf %6, %8 : vector<4x1xf32>
    %c0_6 = arith.constant 0 : index
    %c0_7 = arith.constant 0 : index
    %c0_8 = arith.constant 0 : index
    %10 = vector.load %arg3[%c0_6, %c0_7, %c0_8] : memref<1x4x1xf32, #tpu.memory_space<vmem>>, vector<1x4x1xf32>
    %11 = vector.shape_cast %10 : vector<1x4x1xf32> to vector<4x1xf32>
    %12 = vector.shape_cast %9 : vector<4x1xf32> to vector<1x4x1xf32>
    tpu.vector_store %arg3[%c0_6, %c0_7, %c0_8], %12 {strides = array<i32>} : memref<1x4x1xf32, #tpu.memory_space<vmem>>, vector<1x4x1xf32>,
    %c0_9 = arith.constant 0 : index
    %c0_10 = arith.constant 0 : index
    %c0_11 = arith.constant 0 : index
    %13 = vector.load %arg4[%c0_9, %c0_10, %c0_11] : memref<1x4x4xf32, #tpu.memory_space<vmem>>, vector<1x4x4xf32>
    %14 = vector.shape_cast %13 : vector<1x4x4xf32> to vector<4x4xf32>
    %cst_12 = arith.constant dense<0.000000e+00> : vector<4x4xf32>
    %15 = tpu.matmul %4, %4, %cst_12 {dimension_numbers = #tpu.dot_dimension_numbers<[1], [1], [0], [0], [0, 0, 1, 0], [], []>} : vector<4x256xf32>, vector<4x256xf32>, vector<4x4xf32> -> vector<4x4xf32>
    %16 = arith.addf %14, %15 : vector<4x4xf32>
    %c0_13 = arith.constant 0 : index
    %c0_14 = arith.constant 0 : index
    %c0_15 = arith.constant 0 : index
    %17 = vector.load %arg4[%c0_13, %c0_14, %c0_15] : memref<1x4x4xf32, #tpu.memory_space<vmem>>, vector<1x4x4xf32>
    %18 = vector.shape_cast %17 : vector<1x4x4xf32> to vector<4x4xf32>
    %19 = vector.shape_cast %16 : vector<4x4xf32> to vector<1x4x4xf32>
    tpu.vector_store %arg4[%c0_13, %c0_14, %c0_15], %19 {strides = array<i32>} : memref<1x4x4xf32, #tpu.memory_space<vmem>>, vector<1x4x4xf32>,
    return
  }
  func.func @transform_0(%arg0: i32, %arg1: i32) -> (i32, i32, i32) {
    %c0_i32 = arith.constant 0 : i32
    %c0_i32_0 = arith.constant 0 : i32
    return %arg0, %c0_i32, %arg1 : i32, i32, i32
  }
  func.func @transform_1(%arg0: i32, %arg1: i32) -> (i32, i32, i32) {
    %c0_i32 = arith.constant 0 : i32
    %c0_i32_0 = arith.constant 0 : i32
    %c0_i32_1 = arith.constant 0 : i32
    return %arg0, %c0_i32, %c0_i32_0 : i32, i32, i32
  }
  func.func @transform_2(%arg0: i32, %arg1: i32) -> (i32, i32, i32) {
    %c0_i32 = arith.constant 0 : i32
    %c0_i32_0 = arith.constant 0 : i32
    %c0_i32_1 = arith.constant 0 : i32
    return %arg0, %c0_i32, %c0_i32_0 : i32, i32, i32
  }
}

</mosaic_0001>

<bundles_post_ra>
// kernel: tpu_custom_call.1
= control target key start
LH: loop header
LB: loop body
LE: loop exit
PB: predicated region body
PF: predicated region fallthrough
CT: control target
= control target key end

     0   :  { %8 = vsyncpa [#allocation3], 0  ;;  %s734_s0 = inlined_call_operand.hbm [shape: f32[2,4,256], index: 0, kind: input, shape index: {}]   ;;  %s735_s1 = inlined_call_operand.vmem [shape: f32[2,4,1], index: 1, kind: output, shape index: {0}]   ;;  %s736_s2 = inlined_call_operand.hbm [shape: f32[2,4,4], index: 2, kind: output, shape index: {1}]  }
   0x1   :  { %10 = vsyncpa [#allocation3 + $0x1], 0 }
   0x2   :  { %11 = vsyncpa [#allocation4], 0 }
   0x3   :  { %13 = vsyncpa [#allocation4 + $0x1], 0  ;;  %s606_s9 = smov 0   ;;  %s608_s10 = smov 0  }
   0x4   :  { %s610_s11 = smov 0   ;;  %s612_s12 = smov 0  }
   0x5   :  { %s614_s13 = smov 0   ;;  %s616_s14 = smov 0  }
   0x6 LB: > { %s397_s15 = sadd.s32 4294967295, %s588_s14   ;;  %s398_s16 = sadd.s32 4294967294, %s588_s14   ;;  %s588_s14 = sphi %s616_s14, %s19_s14   ;;  %s584_s13 = sphi %s614_s13, %s745_s13   ;;  %s580_s12 = sphi %s612_s12, %s744_s12   ;;  %s576_s11 = sphi %s610_s11, %s743_s11   ;;  %s572_s10 = sphi %s608_s10, %s742_s10   ;;  %s568_s9 = sphi %s606_s9, %s741_s9  }
   0x7   : > { %s31_s17 = sadd.s32 1, %s584_s13  ;;  %s40_s18 = sadd.s32 1, %s576_s11 }
   0x8   : > { %p33_p0 = scmp.ge.s32.totalorder %s31_s17, 2  ;;  %p47_p1 = scmp.ne.s32.totalorder %s576_s11, %s572_s10 }
   0x9   : > { %p48_p2 = scmp.eq.s32.totalorder %s588_s14, 0  ;;  %p53_p3 = scmp.ne.s32.totalorder %s572_s10, %s568_s9 }
   0xa   : > { %s747_s17 = smov (%p33_p0, %s31_s17), 0  ;;  %p54_p5 = scmp.eq.s32.totalorder %s397_s15, 0 }
   0xb   : > { %p647_p4 = por %p48_p2, %p47_p1  ;;  %s35_s20 = ssub.s32 %s584_s13, %s747_s17 }
   0xc   : > { %p103_p6 = scmp.eq.s32.totalorder %s397_s15, 1  ;;  %p38_p7 = scmp.eq.s32.totalorder %s35_s20, 0 }
   0xd   : > { %p653_p8 = por %p54_p5, %p53_p3  ;;  %p109_p10 = scmp.eq.s32.totalorder %s398_s16, 1 }
   0xe   : > { %p657_p9 = por %p103_p6, %p47_p1  ;;  %p400_p12 = scmp.ge.s32.totalorder %s588_s14, 2 }
   0xf   : > { %s662_s23 = scalar_select %p38_p7, %s576_s11, %s40_s18  }
  0x10   : > { %p664_p11 = por %p109_p10, %p53_p3  ;;  %p425_p13 = scmp.lt.s32.totalorder %s588_s14, 2 }
  0x11   : > { %s129_s25 = sand.u32 1, %s576_s11   ;;  %s412_s27 = sshll.u32 %s584_s13, 3 }
  0x12   : > { %s401_s26 = sshll.u32 %s129_s25, 3  ;;  %s140_s30 = scalar_lea.hbm %s734_s0, %s412_s27 }
  0x13   : > { %s133_s3 = scalar_lea.vmem [#allocation2], %s401_s26  ;;  %s142_s5 = sshll.u32 %s140_s30, 4  ;;  %s143_s5 = int_to_ptr.hbm [resolvable:$true] %s142_s5 }
  0x14   : > { %s144_s4 = sshll.u32 %s133_s3, 4  ;;  %p418_p0 = pnand %p425_p13, %p647_p4  ;;  %s145_s4 = int_to_ptr.vmem [resolvable:$true] %s144_s4 }
  0x15   : > { %p404_p1 = scmp.ge.s32.totalorder %s588_s14, 1  ;;  %p149_p2 = scmp.lt.s32.totalorder %s588_s14, 3 }
  0x16   : > { %s130_s6 = scalar_lea.sflag [#allocation3], %s129_s25 }
  0x17   : > { %420 = dma.hbm_to_vmem [thread:$0]  (!%p418_p0), %s143_s5, 128, %s145_s4, %s130_s6  }
  0x18   : > { %p150_p3 = pnand %p404_p1, %p149_p2 }
  0x19   : > { %s680_s7 = sand.u32 (!%p150_p3), 1, %s572_s10  }
  0x1a   : > { %153 = sbr.rel (%p150_p3) target bundleno = 193 (0xc1), region = 24  ;;  %s405_s8 = sshll.u32 (!%p150_p3), %s680_s7, 3 }
  0x1b   : > { %s156_s15 = scalar_lea.sflag (!%p150_p3), [#allocation3], %s680_s7  ;;  %s159_s16 = scalar_lea.vmem (!%p150_p3), [#allocation2], %s405_s8 }
  0x1f   : > { %559 = dma.done.wait (%p653_p8), %s156_s15, 128  }
  0x20   : > { %561 = vsyncadd (%p653_p8), %s156_s15, 4294967168  ;;  %v198_v0 = vld [vmem:[%s159_s16] sm:$0xff]  ;;  %vm206_vm0 = vcmask 1043456   ;;  %p186_p4 = scmp.lt.s32.totalorder %s580_s12, 1  ;;  %s406_s19 = sshll.u32 %s680_s7, 2  ;;  %vm196_vm1 = vcmask 27648  }
  0x21   : > { %201 = vst [vmem:[#allocation1] ss:$2 sm:$0xff] %v198_v0  ;;  %s184_s27 = scalar_lea.vmem [#allocation5], %s406_s19  ;;  %v590_v10 = vmov 0.0   ;;  %vm194_vm2 = vcmask 3072   ;;  %s409_s28 = sshll.u32 %s580_s12, 2 }
  0x22   : > { %s187_s18 = scalar_select %p186_p4, %s580_s12, 1  ;;  %197 = vst.msk [vmem:[%s184_s27] sm:$0xf] %vm196_vm1, %v590_v10 }
  0x23   : > { %s287_s3 = scalar_lea.hbm %s736_s2, %s409_s28  ;;  %s289_s4 = sshll.u32 %s184_s27, 4  ;;  %s290_s4 = int_to_ptr.vmem [resolvable:$true] %s289_s4 }
  0x24   : > { %s407_s20 = sshll.u32 %s187_s18, 2  ;;  %s291_s5 = sshll.u32 %s287_s3, 4  ;;  %s292_s5 = int_to_ptr.hbm [resolvable:$true] %s291_s5 }
  0x25   : > { %s189_s26 = scalar_lea.vmem %s735_s1, %s407_s20  ;;  %s274_s6 = scalar_lea.sflag [#allocation4], %s680_s7 }
  0x26   : > { %195 = vst.msk [vmem:[%s189_s26] sm:$0xf] %vm194_vm2, %v590_v10  ;;  %s520_s8 = sshra.s32 %s292_s5, 4  ;;  %s526_s18 = scalar_lea.hbm %s736_s2, 8  ;;  %s521_s8 = int_to_ptr.hbm [resolvable:$true] %s520_s8 }
  0x27   : > { %s522_s12 = scalar_lea.hbm %s521_s8, 4  ;;  %p527_p8 = scmp.lt.s32.totalorder %s521_s8, %s736_s2 }
  0x28   : > { %v202_v1 = vld.sshfl [vmem:[#allocation1] sm:$0xff pattern:$0x75316420]  ;;  %v203_v2 = vld.sshfl [vmem:[#allocation1 + $0x8] sm:$0xff pattern:$0x75316420]  ;;  %p523_p5 = scmp.ne.s32.totalorder %s521_s8, %s522_s12  ;;  %p528_p10 = scmp.lt.s32.totalorder %s526_s18, %s522_s12 }
  0x29   : > { %216 = vst [vmem:[#allocation1] ss:$2 sm:$0xff] %v198_v0  ;;  %v207_v3 = vsel %vm206_vm0, %v202_v1, 0.0  ;;  %v208_v4 = vsel %vm206_vm0, %v203_v2, 0.0  ;;  %v215_v15 = vld [vmem:[%s184_s27] sm:$0xf] }
  0x2a   : > { %v209_v5 = vadd.f32 %v208_v4, %v207_v3  ;;  %p524_p6 = pnand %p523_p5, %p657_p9  ;;  %p529_p13 = por %p528_p10, %p527_p8 }
  0x2c   : > { %210 = vadd.xlane.f32.xlu0 %v209_v5  ;;  %p525_p7 = pneg %p524_p6 }
  0x2d   : > { %v199_v11 = vld [vmem:[%s189_s26] sm:$0xf] }
  0x2e   : > { %p530_p0 = pnand %p529_p13, %p525_p7 }
  0x30   : > { %v217_v6 = vld.sshfl [vmem:[#allocation1] sm:$0xff pattern:$0x75316420]  ;;  %v218_v7 = vld.sshfl [vmem:[#allocation1 + $0x8] sm:$0xff pattern:$0x75316420] }
  0x31   : > { %221 = vst [vmem:[#allocation1] ss:$2 sm:$0xff] %v198_v0 }
  0x38   : > { %v222_v8 = vld.sshfl [vmem:[#allocation1] sm:$0xff pattern:$0x75316420]  ;;  %v223_v9 = vld.sshfl [vmem:[#allocation1 + $0x8] sm:$0xff pattern:$0x75316420] }
  0x39   : > { %241 = vmatpush.xpose.msra.mxu0 %v222_v8  ;;  %261 = vmatpush.xpose.msra.mxu1 %v223_v9 }
  0x3c   : > { %242 = vmatmul.f32.vlgmr.msra.gmra.mxu0 %v217_v6  ;;  %262 = vmatmul.f32.vlgmr.msra.gmra.mxu1 %v218_v7 }
  0x9f   : > { %v211_v12 = vpop.xlane.xlu0 %210 }
  0xa0   : > { %v212_v13 = vadd.f32 %v211_v12, %v199_v11 }
  0xa2   : > { %214 = vst.msk [vmem:[%s189_s26] sm:$0xf] %vm194_vm2, %v212_v13 }
  0xb9   : > { %v243_v14 = vpop.f32.mrf.mxu0  ;;  %v263_v16 = vpop.f32.mrf.mxu1 }
  0xba   : > { %v264_v17 = vadd.f32 %v263_v16, %v243_v14 }
  0xbc   : > { %v266_v18 = vadd.f32 %v264_v17, %v215_v15 }
  0xbe   : > { %268 = vst.msk [vmem:[%s184_s27] sm:$0xf] %vm196_vm1, %v266_v18 }
  0xbf   : > { %533 = shalt.err (!%p530_p0)
}
  0xc0   : > { %415 = dma.vmem_to_hbm [thread:$0]  (%p657_p9), %s290_s4, 64, %s292_s5, %s274_s6  }
  0xc1 PF: > { %s310_s7 = sand.u32 1, %s568_s9   ;;  %p422_p1 = pnand %p400_p12, %p664_p11 }
  0xc2   : > { %s311_s21 = scalar_lea.sflag [#allocation4], %s310_s7 }
  0xc3   : > { %p423_p2 = pneg %p422_p1 }
  0xc5   : > { %563 = dma.done.wait (%p423_p2), %s311_s21, 64  }
  0xc6   : > { %565 = vsyncadd (%p423_p2), %s311_s21, 4294967232  ;;  %s19_s14 = sadd.s32 1, %s588_s14   ;;  %s741_s9 = smov %s572_s10 }
  0xc7   : > { %p16_p3 = scmp.ge.s32.totalorder %s19_s14, 4   ;;  %s742_s10 = smov %s576_s11 }
  0xc8   : > { %s743_s11 = smov %s662_s23  ;;  %s744_s12 = smov %s584_s13 }
  0xc9   : > { %s745_s13 = smov %s747_s17  ;;  %18 = sbr.rel (!%p16_p3) target bundleno = 6 (0x6), region = 85 }
  0xce   :  { %317 = vsyncpa [#allocation3], 1 }
  0xcf   :  { %319 = vsyncpa [#allocation3 + $0x1], 1 }
  0xd0   :  { %320 = vsyncpa [#allocation4], 1 }
  0xd1   :  { %322 = vsyncpa [#allocation4 + $0x1], 1 }

</bundles_post_ra>
